<compile_context>
chip_gen: v7x
topology: tpu7x:2x2x1
jax: 0.10.0
libtpu: 0.0.40
codegen_flags: <defaults>
</compile_context>

<pallas_src>
import jax
import jax.numpy as jnp
from jax.experimental import pallas as pl
from jax.experimental.pallas import tpu as pltpu

_LANE = 128


def _solarize_kernel_batched(x_ref, thr_ref, b_ref, o_ref):
    """One (R_TILE, 128) tile of a single batch element.

    thr_ref / b_ref hold the full (B, 1) per-batch scalars resident in SMEM;
    the current batch's values are fetched with program_id(0) and broadcast
    in-register by the VPU.
    """
    b = pl.program_id(0)
    thr = thr_ref[b, 0]
    bl = b_ref[b, 0]
    x = x_ref[...].astype(jnp.float32)
    sol = jnp.where(x < thr, x, 1.0 - x)      # strict '<' matches torch.where(out < treshold, ...)
    sol = jnp.clip(sol, 0.0, 1.0)             # load-bearing if x can leave [0, 1]
    o_ref[...] = (x + bl * (sol - x)).astype(o_ref.dtype)


def _solarize_kernel_flat(x_ref, thr_ref, b_ref, o_ref):
    """Fallback path: one (B, TILE_N) tile of the flattened (B, N) view.

    thr/b are tiny (B, 1) VMEM blocks (constant block index -> fetched once)
    that broadcast in-vreg across the lane axis.
    """
    x = x_ref[...].astype(jnp.float32)
    thr = thr_ref[...]
    bl = b_ref[...]
    sol = jnp.clip(jnp.where(x < thr, x, 1.0 - x), 0.0, 1.0)
    o_ref[...] = (x + bl * (sol - x)).astype(o_ref.dtype)


def _choose_r_tile(B, R, itemsize, target_block_bytes, min_total_steps=8):
    """Rows per block for the (R, 128) per-batch view.

    Sized from a byte budget (memory-bound op: big blocks amortize the
    ~0.35 us per-grid-step overhead), rounded to a multiple of 32 so packed
    sub-32-bit dtypes keep dense sublane tiling, and shrunk (down to ~256 KiB
    blocks) only if needed to keep >= min_total_steps grid steps so v7x's two
    TensorCores can share the grid.
    """
    rows = target_block_bytes // (_LANE * itemsize)
    rows = max(32, (rows // 32) * 32)
    rows = min(rows, R)
    min_rows = max(32, ((256 * 1024) // (_LANE * itemsize) // 32) * 32)
    while (B * pl.cdiv(R, rows) < min_total_steps) and rows > min_rows:
        rows = max(min_rows, ((rows // 2) // 32) * 32)
    if rows >= R:
        return R
    return rows


def _choose_flat_tile(B, N, itemsize, target_block_bytes):
    """Lane-axis tile width for the fallback (B, N) layout."""
    tile = target_block_bytes // (max(B, 1) * itemsize)
    tile = max(_LANE, (tile // _LANE) * _LANE)
    tile = min(tile, pl.cdiv(N, _LANE) * _LANE)
    return tile


def solarize_forward(x, thresholds, blend_soft, *, target_block_bytes=2 << 20):
    """Fused DSolarize forward pass.

    Args:
      x:          (B, ...) float array, nominally in [0, 1].
      thresholds: per-batch solarize threshold, shape (B, 1), (B,), or (1,).
      blend_soft: per-batch soft application prob, same shapes accepted.
      target_block_bytes: per-block byte budget (default 2 MiB -> ~8 MiB live
        with double-buffered in+out blocks, safe on v5e/v6e/v7x defaults).

    Returns:
      Array with the same shape and dtype as x.
    """
    orig_shape = x.shape
    B = int(orig_shape[0])
    N = 1
    for d in orig_shape[1:]:
        N *= int(d)

    thr = jnp.broadcast_to(jnp.asarray(thresholds, jnp.float32).reshape(-1, 1), (B, 1))
    bsf = jnp.broadcast_to(jnp.asarray(blend_soft, jnp.float32).reshape(-1, 1), (B, 1))
    itemsize = jnp.dtype(x.dtype).itemsize

    if N % _LANE == 0:
        # Main path: per-batch (R, 128) view -> lane/sublane-dense tiles,
        # independent of B.  Pure bitcast reshape, no HBM pass.
        R = N // _LANE
        xv = x.reshape(B, R, _LANE)
        r_tile = _choose_r_tile(B, R, itemsize, target_block_bytes)
        grid = (B, pl.cdiv(R, r_tile))
        out = pl.pallas_call(
            _solarize_kernel_batched,
            out_shape=jax.ShapeDtypeStruct((B, R, _LANE), x.dtype),
            grid_spec=pltpu.PrefetchScalarGridSpec(
                num_scalar_prefetch=0,
                grid=grid,
                in_specs=[
                    # Large lane/sublane-dense data tile, streamed over the grid.
                    pl.BlockSpec((None, r_tile, _LANE), lambda b, r: (b, r, 0)),
                    # Per-batch scalars: whole (B, 1) arrays resident in SMEM,
                    # indexed by program_id(0) inside the kernel.
                    pl.BlockSpec(memory_space=pltpu.MemorySpace.SMEM),
                    pl.BlockSpec(memory_space=pltpu.MemorySpace.SMEM),
                ],
                out_specs=pl.BlockSpec((None, r_tile, _LANE), lambda b, r: (b, r, 0)),
            ),
            compiler_params=pltpu.CompilerParams(
                # Every (b, r) block is independent -> shard across TensorCores
                # on multi-TC parts (v7x); harmless no-op on v5e/v6e.
                dimension_semantics=("parallel", "parallel")),
        )(xv, thr, bsf)
        return out.reshape(orig_shape)

    # Fallback (N not a multiple of 128): flat (B, N) view.  The ragged last
    # block is masked by Pallas on store -- no host-side jnp.pad / slice pass.
    xf = x.reshape(B, N)
    tile = _choose_flat_tile(B, N, itemsize, target_block_bytes)
    grid = (pl.cdiv(N, tile),)
    out = pl.pallas_call(
        _solarize_kernel_flat,
        out_shape=jax.ShapeDtypeStruct((B, N), x.dtype),
        grid_spec=pltpu.PrefetchScalarGridSpec(
            num_scalar_prefetch=0,
            grid=grid,
            in_specs=[
                pl.BlockSpec((B, tile), lambda i: (0, i)),
                # Tiny per-batch scalars: constant block index -> fetched once,
                # kept resident in VMEM across the whole grid.
                pl.BlockSpec((B, 1), lambda i: (0, 0)),
                pl.BlockSpec((B, 1), lambda i: (0, 0)),
            ],
            out_specs=pl.BlockSpec((B, tile), lambda i: (0, i)),
        ),
        compiler_params=pltpu.CompilerParams(dimension_semantics=("parallel",)),
    )(xf, thr, bsf)
    return out.reshape(orig_shape)


def dsolarize_forward(x, key, *, low_m=0.3, high_m=0.9):
    """DSolarize.forward stand-in: sample per-batch threshold m and soft
    application prob b, then apply the fused solarize + blend kernel."""
    # TODO(synk): exact DAugmentation.rsample_m / rsample_b / aug_transform
    # semantics are unavailable; uniform sampling + per-batch soft blend
    # (x + b*(solarize(x) - x)) is used as a stand-in.
    B = x.shape[0]
    k_m, k_b = jax.random.split(key)
    m = jax.random.uniform(k_m, (B, 1), jnp.float32, low_m, high_m)
    b_soft = jax.random.uniform(k_b, (B, 1), jnp.float32, 0.0, 1.0)
    return solarize_forward(x, m, b_soft)


if __name__ == "__main__":
    key = jax.random.PRNGKey(0)
    k_x, k_m, k_b, k_x2 = jax.random.split(key, 4)

    # Main (lane-aligned) path: N = 4*16*16 = 1024 = 8 * 128.
    B, C, H, W = 2, 4, 16, 16
    x = jax.random.uniform(k_x, (B, C, H, W), jnp.float32)
    m = jax.random.uniform(k_m, (B, 1), jnp.float32, 0.3, 0.9)
    b_soft = jax.random.uniform(k_b, (B, 1), jnp.float32, 0.0, 1.0)

    out = jax.block_until_ready(solarize_forward(x, m, b_soft))

    xf = x.reshape(B, -1)
    sol = jnp.clip(jnp.where(xf < m, xf, 1.0 - xf), 0.0, 1.0)
    ref = (xf + b_soft * (sol - xf)).reshape(B, C, H, W)
    assert out.shape == (B, C, H, W)
    assert out.dtype == x.dtype
    assert jnp.allclose(out, ref, atol=1e-6), float(jnp.max(jnp.abs(out - ref)))

    # Fallback (ragged) path: N = 3*5*7 = 105, not a multiple of 128.
    x2 = jax.random.uniform(k_x2, (B, 3, 5, 7), jnp.float32)
    out2 = jax.block_until_ready(solarize_forward(x2, m, b_soft))
    xf2 = x2.reshape(B, -1)
    sol2 = jnp.clip(jnp.where(xf2 < m, xf2, 1.0 - xf2), 0.0, 1.0)
    ref2 = (xf2 + b_soft * (sol2 - xf2)).reshape(x2.shape)
    assert jnp.allclose(out2, ref2, atol=1e-6), float(jnp.max(jnp.abs(out2 - ref2)))

    print("KERNEL_OK")
</pallas_src>

<mosaic_0001>
module attributes {stable_mosaic.version = 11 : i64} {
  func.func @_solarize_kernel_batched(%arg0: i32, %arg1: i32, %arg2: memref<1x8x128xf32, #tpu.memory_space<vmem>>, %arg3: memref<2x1xf32, #tpu.memory_space<smem>>, %arg4: memref<2x1xf32, #tpu.memory_space<smem>>, %arg5: memref<1x8x128xf32, #tpu.memory_space<vmem>>) attributes {dimension_semantics = [#tpu.dimension_semantics<parallel>, #tpu.dimension_semantics<parallel>], iteration_bounds = array<i64: 2, 1>, scalar_prefetch = 0 : i64, scratch_operands = 0 : i64, tpu.core_type = #tpu.core_type<tc>, window_params = [{transform_indices = @transform_0, window_bounds = array<i64: 1, 8, 128>}, {transform_indices = @transform_1, window_bounds = array<i64: 2, 1>}, {transform_indices = @transform_2, window_bounds = array<i64: 2, 1>}, {transform_indices = @transform_3, window_bounds = array<i64: 1, 8, 128>}]} {
    %0 = arith.index_cast %arg0 : i32 to index
    %c0 = arith.constant 0 : index
    %1 = memref.load %arg3[%0, %c0] : memref<2x1xf32, #tpu.memory_space<smem>>
    %2 = arith.index_cast %arg0 : i32 to index
    %c0_0 = arith.constant 0 : index
    %3 = memref.load %arg4[%2, %c0_0] : memref<2x1xf32, #tpu.memory_space<smem>>
    %c0_1 = arith.constant 0 : index
    %c0_2 = arith.constant 0 : index
    %c0_3 = arith.constant 0 : index
    %4 = vector.load %arg2[%c0_1, %c0_2, %c0_3] : memref<1x8x128xf32, #tpu.memory_space<vmem>>, vector<1x8x128xf32>
    %5 = vector.shape_cast %4 : vector<1x8x128xf32> to vector<8x128xf32>
    %6 = vector.broadcast %1 : f32 to vector<8x128xf32>
    %7 = arith.cmpf olt, %5, %6 : vector<8x128xf32>
    %cst = arith.constant 1.000000e+00 : f32
    %8 = vector.broadcast %cst : f32 to vector<8x128xf32>
    %9 = arith.subf %8, %5 : vector<8x128xf32>
    %10 = arith.select %7, %5, %9 : vector<8x128xi1>, vector<8x128xf32>
    %cst_4 = arith.constant 0.000000e+00 : f32
    %cst_5 = arith.constant 1.000000e+00 : f32
    %11 = vector.broadcast %cst_4 : f32 to vector<8x128xf32>
    %12 = arith.maximumf %11, %10 : vector<8x128xf32>
    %13 = vector.broadcast %cst_5 : f32 to vector<8x128xf32>
    %14 = arith.minimumf %13, %12 : vector<8x128xf32>
    %15 = arith.subf %14, %5 : vector<8x128xf32>
    %16 = vector.broadcast %3 : f32 to vector<8x128xf32>
    %17 = arith.mulf %16, %15 : vector<8x128xf32>
    %18 = arith.addf %5, %17 : vector<8x128xf32>
    %c0_6 = arith.constant 0 : index
    %c0_7 = arith.constant 0 : index
    %c0_8 = arith.constant 0 : index
    %19 = vector.load %arg5[%c0_6, %c0_7, %c0_8] : memref<1x8x128xf32, #tpu.memory_space<vmem>>, vector<1x8x128xf32>
    %20 = vector.shape_cast %19 : vector<1x8x128xf32> to vector<8x128xf32>
    %21 = vector.shape_cast %18 : vector<8x128xf32> to vector<1x8x128xf32>
    tpu.vector_store %arg5[%c0_6, %c0_7, %c0_8], %21 {strides = array<i32>} : memref<1x8x128xf32, #tpu.memory_space<vmem>>, vector<1x8x128xf32>,
    return
  }
  func.func @transform_0(%arg0: i32, %arg1: i32) -> (i32, i32, i32) {
    %c0_i32 = arith.constant 0 : i32
    %c0_i32_0 = arith.constant 0 : i32
    return %arg0, %arg1, %c0_i32 : i32, i32, i32
  }
  func.func @transform_1(%arg0: i32, %arg1: i32) -> (i32, i32) {
    %c0_i32 = arith.constant 0 : i32
    %c0_i32_0 = arith.constant 0 : i32
    %c0_i32_1 = arith.constant 0 : i32
    return %c0_i32, %c0_i32_0 : i32, i32
  }
  func.func @transform_2(%arg0: i32, %arg1: i32) -> (i32, i32) {
    %c0_i32 = arith.constant 0 : i32
    %c0_i32_0 = arith.constant 0 : i32
    %c0_i32_1 = arith.constant 0 : i32
    return %c0_i32, %c0_i32_0 : i32, i32
  }
  func.func @transform_3(%arg0: i32, %arg1: i32) -> (i32, i32, i32) {
    %c0_i32 = arith.constant 0 : i32
    %c0_i32_0 = arith.constant 0 : i32
    return %arg0, %arg1, %c0_i32 : i32, i32, i32
  }
}

</mosaic_0001>

<bundles_post_ra>
// kernel: tpu_custom_call.1
= control target key start
LH: loop header
LB: loop body
LE: loop exit
PB: predicated region body
PF: predicated region fallthrough
CT: control target
= control target key end

     0   :  { %8 = vsyncpa [#allocation3], 0  ;;  %s849_s0 = inlined_call_operand.hbm [shape: f32[2,8,128], index: 0, kind: input, shape index: {}]   ;;  %s850_s1 = inlined_call_operand.vmem [shape: f32[2,1], index: 1, kind: input, shape index: {}]   ;;  %s851_s2 = inlined_call_operand.vmem [shape: f32[2,1], index: 2, kind: input, shape index: {}]   ;;  %s852_s3 = inlined_call_operand.hbm [shape: f32[2,8,128], index: 3, kind: output, shape index: {}]  }
   0x1   :  { %10 = vsyncpa [#allocation3 + $0x1], 0 }
   0x2   :  { %11 = vsyncpa [#allocation5], 0 }
   0x3   :  { %12 = vsyncpa [#allocation8], 0 }
   0x4   :  { %13 = vsyncpa [#allocation4], 0 }
   0x5   :  { %15 = vsyncpa [#allocation4 + $0x1], 0  ;;  %s639_s12 = smov 0   ;;  %s641_s13 = smov 0  }
   0x6   :  { %s643_s14 = smov 0   ;;  %s645_s15 = smov 0  }
   0x7   :  { %s647_s16 = smov 0   ;;  %s649_s17 = smov 0  }
   0x8 LB: > { %s362_s18 = sadd.s32 4294967295, %s613_s17   ;;  %s363_s19 = sadd.s32 4294967294, %s613_s17   ;;  %s613_s17 = sphi %s649_s17, %s21_s17   ;;  %s609_s16 = sphi %s647_s16, %s875_s16   ;;  %s605_s15 = sphi %s645_s15, %s874_s15   ;;  %s601_s14 = sphi %s643_s14, %s873_s14   ;;  %s597_s13 = sphi %s641_s13, %s872_s13   ;;  %s593_s12 = sphi %s639_s12, %s871_s12  }
   0x9   : > { %p55_p0 = scmp.ne.s32.totalorder %s597_s13, %s593_s12  ;;  %p673_p1 = scmp.eq.s32.totalorder %s362_s18, 0 }
   0xa   : > { %p677_p2 = scmp.eq.s32.totalorder %s362_s18, 1  ;;  %p129_p3 = scmp.eq.s32.totalorder %s363_s19, 1 }
   0xb   : > { %s857_s20 = scalar_select %p673_p1, 1, 0 }
   0xc   : > { %s858_s21 = scalar_select %p677_p2, 1, 0 }
   0xd   : > { %p683_p4 = por %p673_p1, %p55_p0  ;;  %p364_p5 = scmp.ge.s32.totalorder %s613_s17, 1 }
   0xe   : > { %p688_p6 = por %p129_p3, %p55_p0  ;;  %p136_p7 = scmp.lt.s32.totalorder %s613_s17, 3 }
   0xf   : > { %s859_s22 = scalar_select %p683_p4, 1, 0 }
  0x10   : > { %s860_s23 = scalar_select %p688_p6, 1, 0 }
  0x11   : > { %s149_s26 = sshll.u32 %s850_s1, 4  ;;  %p696_p8 = pnand %p364_p5, %p136_p7  ;;  %s150_s26 = int_to_ptr.vmem [resolvable:$true] %s149_s26 }
  0x12   : > { %s160_s30 = sshll.u32 %s851_s2, 4  ;;  %s463_s5 = scalar_lea.vmem %s150_s26, 32  ;;  %s161_s30 = int_to_ptr.vmem [resolvable:$true] %s160_s30 }
  0x13   : > { %s861_s27 = scalar_select %p696_p8, 1, 0 }
  0x14   : > { %p392_p10 = pneg %p696_p8  ;;  %p464_p12 = scmp.ne.s32.totalorder %s150_s26, %s463_s5 }
  0x15   : > { %p471_p5 = scmp.lt.s32.totalorder %s150_s26, %s150_s26  ;;  %p472_p7 = scmp.lt.s32.totalorder %s463_s5, %s463_s5 }
  0x16   : > { %p708_p11 = pnand %p392_p10, %p673_p1 }
  0x17   : > { %p473_p9 = por %p472_p7, %p471_p5 }
  0x18   : > { %p465_p13 = pneg %p708_p11 }
  0x1a   : > { %p466_p0 = pnand %p465_p13, %p464_p12 }
  0x1c   : > { %p467_p3 = pneg %p466_p0 }
  0x1e   : > { %p474_p6 = pnand %p473_p9, %p467_p3 }
  0x20   : > { %477 = shalt.err (!%p474_p6)
}
  0x21   : > { %s615_s6 = smov [#allocation6]   ;;  %s478_s7 = scalar_lea.vmem %s161_s30, 32 }
  0x22   : > { %395 = dma.vmem_to_smem (!%p708_p11), %s150_s26, 32, %s615_s6, [#allocation5]  }
  0x23   : > { %p479_p10 = scmp.ne.s32.totalorder %s161_s30, %s478_s7  ;;  %p486_p8 = scmp.lt.s32.totalorder %s161_s30, %s161_s30 }
  0x24   : > { %p487_p2 = scmp.lt.s32.totalorder %s478_s7, %s478_s7 }
  0x25   : > { %p481_p1 = pnand %p479_p10, %p465_p13 }
  0x26   : > { %p488_p12 = por %p487_p2, %p486_p8 }
  0x27   : > { %p482_p4 = pneg %p481_p1 }
  0x29   : > { %p489_p0 = pnand %p488_p12, %p482_p4 }
  0x2b   : > { %492 = shalt.err (!%p489_p0)
}
  0x2c   : > { %s616_s8 = smov [#allocation7]   ;;  %s33_s9 = sadd.s32 1, %s609_s16 }
  0x2d   : > { %398 = dma.vmem_to_smem (!%p708_p11), %s161_s30, 32, %s616_s8, [#allocation8]  }
  0x2e   : > { %s42_s10 = sadd.s32 1, %s601_s14  ;;  %p35_p1 = scmp.ge.s32.totalorder %s33_s9, 2 }
  0x2f   : > { %p49_p2 = scmp.ne.s32.totalorder %s601_s14, %s597_s13  ;;  %p50_p4 = scmp.eq.s32.totalorder %s613_s17, 0 }
  0x30   : > { %p409_p6 = scmp.lt.s32.totalorder %s613_s17, 2  ;;  %s877_s9 = smov (%p35_p1, %s33_s9), 0 }
  0x31   : > { %p51_p8 = por %p50_p4, %p49_p2  ;;  %p863_p9 = scmp.ne.s32.totalorder %s858_s21, 0 }
  0x32   : > { %s37_s18 = ssub.s32 %s609_s16, %s877_s9  ;;  %s171_s19 = sand.u32 1, %s601_s14  }
  0x33   : > { %p728_p13 = por %p863_p9, %p49_p2  ;;  %p40_p3 = scmp.eq.s32.totalorder %s37_s18, 0 }
  0x34   : > { %s368_s24 = sshll.u32 %s171_s19, 3  ;;  %s369_s25 = sshll.u32 %s609_s16, 7 }
  0x35   : > { %s737_s26 = scalar_select %p40_p3, %s601_s14, %s42_s10  }
  0x36   : > { %s742_s30 = scalar_lea.hbm %s849_s0, %s369_s25  ;;  %s175_s21 = scalar_lea.vmem [#allocation2], %s368_s24 }
  0x37   : > { %s183_s4 = sshll.u32 %s175_s21, 4  ;;  %p746_p11 = pnand %p409_p6, %p51_p8  ;;  %s750_s4 = int_to_ptr.vmem [resolvable:$true] %s183_s4 }
  0x38   : > { %s172_s6 = scalar_lea.sflag [#allocation3], %s171_s19  ;;  %s493_s7 = scalar_lea.hbm %s742_s30, 128 }
  0x39   : > { %p494_p5 = scmp.ne.s32.totalorder %s742_s30, %s493_s7  ;;  %p495_p7 = pneg %p746_p11 }
  0x3a   : > { %s498_s18 = scalar_lea.hbm %s849_s0, 256  ;;  %p499_p0 = scmp.lt.u32.totalorder %s742_s30, %s849_s0 }
  0x3b   : > { %p496_p10 = pnand %p495_p7, %p494_p5  ;;  %p500_p1 = scmp.lt.u32.totalorder %s498_s18, %s493_s7 }
  0x3c   : > { %p502_p4 = scmp.lt.u32.totalorder %s493_s7, %s742_s30 }
  0x3d   : > { %p497_p12 = pneg %p496_p10  ;;  %p501_p2 = por %p500_p1, %p499_p0 }
  0x3f   : > { %p503_p6 = por %p502_p4, %p501_p2 }
  0x41   : > { %p504_p8 = pnand %p503_p6, %p497_p12 }
  0x43   : > { %507 = shalt.err (!%p504_p8)
}
  0x44   : > { %s508_s19 = scalar_lea.vmem %s750_s4, 128  ;;  %s617_s28 = smov [#allocation2]  }
  0x45   : > { %p509_p9 = scmp.ne.s32.totalorder %s750_s4, %s508_s19  ;;  %s513_s29 = sshll.u32 %s617_s28, 4  ;;  %s514_s29 = int_to_ptr.vmem [resolvable:$false] %s513_s29 }
  0x46   : > { %s515_s21 = scalar_lea.vmem %s514_s29, 256  ;;  %p516_p10 = scmp.lt.s32.totalorder %s750_s4, %s514_s29 }
  0x47   : > { %p511_p3 = pnand %p509_p9, %p495_p7  ;;  %p517_p0 = scmp.lt.s32.totalorder %s515_s21, %s508_s19 }
  0x49   : > { %p512_p5 = pneg %p511_p3  ;;  %p518_p1 = por %p517_p0, %p516_p10 }
  0x4b   : > { %p519_p2 = pnand %p518_p1, %p512_p5 }
  0x4d   : > { %522 = shalt.err (!%p519_p2)
}
  0x4e   : > { %402 = dma.hbm_to_vmem [thread:$0]  (!%p746_p11), %s742_s30, 128, %s750_s4, %s172_s6  }
  0x4f   : > { %p866_p12 = scmp.ne.s32.totalorder %s861_s27, 0 }
  0x50   : > { %s780_s7 = sand.u32 (!%p866_p12), 1, %s597_s13   ;;  %p867_p7 = scmp.ne.s32.totalorder (!%p866_p12), %s859_s22, 0 }
  0x51   : > { %192 = sbr.rel (%p866_p12) target bundleno = 130 (0x82), region = 32  ;;  %s371_s8 = sshll.u32 (!%p866_p12), %s780_s7, 3 }
  0x52   : > { %s195_s10 = scalar_lea.sflag (!%p866_p12), [#allocation3], %s780_s7  ;;  %s198_s18 = scalar_lea.vmem (!%p866_p12), [#allocation2], %s371_s8 }
  0x58   : > { %576 = dma.done.wait (%p867_p7), %s195_s10, 128  }
  0x59   : > { %578 = vsyncadd (%p867_p7), %s195_s10, 4294967168  ;;  %p868_p4 = scmp.ne.s32.totalorder %s857_s20, 0 }
  0x5b   : > { %580 = dma.done.wait (%p868_p4), [#allocation5], 32  }
  0x5c   : > { %582 = vsyncadd (%p868_p4), [#allocation5], 4294967264 }
  0x5d   : > { %584 = dma.done.wait (%p868_p4), [#allocation8], 32  }
  0x5e   : > { %586 = vsyncadd (%p868_p4), [#allocation8], 4294967264 }
  0x5f   : > { %211 = sfence }
  0x60   : > { %s375_s27 = sshll.u32 %s605_s15, 7  ;;  %v233_v0 = vld [vmem:[%s198_s18] sm:$0xff]  ;;  %s229_s22 = scalar_lea.vmem [#allocation9], %s371_s8 }
  0x61   : > { %s231_s30 = sld [smem:[#allocation6 + %s375_s27]]  ;;  %v236_v1 = vsub.f32 1.0, %v233_v0  ;;  %s260_s5 = sshll.u32 %s229_s22, 4  ;;  %s797_s5 = int_to_ptr.vmem [resolvable:$true] %s260_s5 }
  0x62   : > { %s232_s4 = sld [smem:[#allocation7 + %s375_s27]]  ;;  %s802_s6 = scalar_lea.hbm %s852_s3, %s375_s27 }
  0x63   : > { %s246_s24 = scalar_lea.sflag [#allocation4], %s780_s7  ;;  %s523_s25 = scalar_lea.vmem %s797_s5, 128 }
  0x64   : > { %p524_p11 = scmp.ne.s32.totalorder %s797_s5, %s523_s25  ;;  %s618_s19 = smov [#allocation9]  }
  0x65   : > { %s527_s28 = sshll.u32 %s618_s19, 4  ;;  %s528_s28 = int_to_ptr.vmem [resolvable:$false] %s527_s28 }
  0x66   : > { %p525_p6 = pnand %p524_p11, %p728_p13  ;;  %s529_s29 = scalar_lea.vmem %s528_s28, 256 }
  0x67   : > { %v234_v2 = vstv %s231_s30  ;;  %p530_p9 = scmp.lt.s32.totalorder %s797_s5, %s528_s28  ;;  %p531_p3 = scmp.lt.s32.totalorder %s529_s29, %s523_s25 }
  0x68   : > { %vm235_vm0 = vcmp.lt.f32.partialorder %v233_v0, %v234_v2  ;;  %v241_v6 = vstv %s232_s4  ;;  %p526_p8 = pneg %p525_p6 }
  0x69   : > { %v237_v3 = vsel %vm235_vm0, %v233_v0, %v236_v1  ;;  %p532_p5 = por %p531_p3, %p530_p9 }
  0x6a   : > { %v238_v4 = vmax.f32 %v237_v3, 0.0 }
  0x6b   : > { %p533_p10 = pnand %p532_p5, %p526_p8 }
  0x6c   : > { %v239_v5 = vmin.f32 %v238_v4, 1.0 }
  0x6e   : > { %v240_v7 = vsub.f32 %v239_v5, %v233_v0 }
  0x70   : > { %v242_v8 = vmul.f32 %v241_v6, %v240_v7 }
  0x72   : > { %v243_v9 = vadd.f32 %v242_v8, %v233_v0 }
  0x74   : > { %244 = vst [vmem:[%s229_s22] sm:$0xff] %v243_v9 }
  0x75   : > { %536 = shalt.err (!%p533_p10)
}
  0x76   : > { %s537_s21 = scalar_lea.hbm %s802_s6, 128  ;;  %s541_s10 = scalar_lea.hbm %s852_s3, 256 }
  0x77   : > { %p538_p0 = scmp.ne.s32.totalorder %s802_s6, %s537_s21  ;;  %p542_p12 = scmp.lt.u32.totalorder %s802_s6, %s852_s3 }
  0x78   : > { %p543_p7 = scmp.lt.u32.totalorder %s541_s10, %s537_s21  ;;  %p545_p11 = scmp.lt.u32.totalorder %s537_s21, %s802_s6 }
  0x79   : > { %p539_p1 = pnand %p538_p0, %p728_p13 }
  0x7a   : > { %p544_p4 = por %p543_p7, %p542_p12 }
  0x7b   : > { %p540_p2 = pneg %p539_p1 }
  0x7c   : > { %p546_p6 = por %p545_p11, %p544_p4 }
  0x7e   : > { %p547_p8 = pnand %p546_p6, %p540_p2 }
  0x80   : > { %550 = shalt.err (!%p547_p8)
}
  0x81   : > { %390 = dma.vmem_to_hbm [thread:$0]  (%p728_p13), %s797_s5, 128, %s802_s6, %s246_s24  }
  0x82 PF: > { %s272_s30 = sand.u32 1, %s593_s12   ;;  %p869_p9 = scmp.ne.s32.totalorder %s860_s23, 0 }
  0x83   : > { %p870_p3 = scmp.ge.s32.totalorder %s613_s17, 2  ;;  %s273_s4 = scalar_lea.sflag [#allocation4], %s272_s30 }
  0x85   : > { %p404_p5 = pnand %p870_p3, %p869_p9 }
  0x87   : > { %588 = dma.done.wait (!%p404_p5), %s273_s4, 128  }
  0x88   : > { %590 = vsyncadd (!%p404_p5), %s273_s4, 4294967168  ;;  %s21_s17 = sadd.s32 1, %s613_s17   ;;  %s871_s12 = smov %s597_s13 }
  0x89   : > { %p18_p10 = scmp.ge.s32.totalorder %s21_s17, 4   ;;  %s872_s13 = smov %s601_s14 }
  0x8a   : > { %s873_s14 = smov %s737_s26  ;;  %s874_s15 = smov %s609_s16 }
  0x8b   : > { %s875_s16 = smov %s877_s9  ;;  %20 = sbr.rel (!%p18_p10) target bundleno = 8 (0x8), region = 86 }
  0x92   :  { %278 = vsyncpa [#allocation3], 1 }
  0x93   :  { %280 = vsyncpa [#allocation3 + $0x1], 1 }
  0x94   :  { %281 = vsyncpa [#allocation4], 1 }
  0x95   :  { %283 = vsyncpa [#allocation4 + $0x1], 1 }
  0x96   :  { %284 = vsyncpa [#allocation5], 1 }
  0x97   :  { %286 = vsyncpa [#allocation5 + $0x1], 1 }
  0x98   :  { %287 = vsyncpa [#allocation8], 1 }

</bundles_post_ra>
